<compile_context>
chip_gen: v7x
topology: tpu7x:2x2x1
jax: 0.10.0
libtpu: 0.0.40
codegen_flags: <defaults>
</compile_context>

<pallas_src>
import math
import jax
import jax.numpy as jnp
from jax.experimental import pallas as pl
from jax.experimental.pallas import tpu as pltpu


BIAS_ROWS = 8          # rows 0..3 of the f32 pack hold b1,b2,b3,b4; 4..7 pad
MLV_PAD = 128          # lane-dense width for the mean||log_var slab


def dense_vae_kernel(x_ref, eps_ref, w1_ref, w4_ref, pack_ref, out_ref):
    # Static dims (trace-time Python ints).
    in_f, out_f = w1_ref.shape            # fc1: (in_features, out_features)
    feat = eps_ref.shape[-1]               # latent features
    feat_pad = out_ref.shape[-1] - in_f    # lane-padded mean||log_var width

    # ---- unpack the small f32 parameter pack (static ref slices) ----
    b1 = pack_ref[0:1, :out_f]                                    # (1, 64)
    b2 = pack_ref[1:2, :feat_pad]                                 # (1, 128) zero-padded
    b3 = pack_ref[2:3, :out_f]                                    # (1, 64)
    b4 = pack_ref[3:4, :in_f]                                     # (1, 256)
    # Weight casts are independent of activations -> scheduled off the chain.
    w2 = pack_ref[BIAS_ROWS:BIAS_ROWS + out_f, :feat_pad].astype(jnp.bfloat16)
    w3 = pack_ref[BIAS_ROWS + out_f:BIAS_ROWS + out_f + feat,
                  :out_f].astype(jnp.bfloat16)

    # ---- encode ----
    # fc1 (+relu): bf16 operands, f32 accumulation.
    h1 = jnp.dot(x_ref[...].astype(jnp.bfloat16), w1_ref[...],
                 preferred_element_type=jnp.float32) + b1
    enc1 = jnp.maximum(h1, 0.0)                                   # relu1

    # fc2: single fused matmul producing mean || log_var (|| zero padding).
    mlv = jnp.dot(enc1.astype(jnp.bfloat16), w2,
                  preferred_element_type=jnp.float32) + b2        # (rows, 128)
    mean = mlv[:, :feat]
    log_var = mlv[:, feat:2 * feat]

    # Lane-dense store of mean||log_var (columns 256..383 of the output slab).
    out_ref[:, in_f:] = mlv

    # ---- reparametrize (all elementwise math stays f32: v5e-safe) ----
    std = jnp.exp(0.5 * log_var)
    z = mean + eps_ref[...] * std                                 # (rows, feat)

    # ---- decode ----
    h3 = jnp.dot(z.astype(jnp.bfloat16), w3,
                 preferred_element_type=jnp.float32) + b3
    h3 = jnp.maximum(h3 + enc1, 0.0)                              # skip + relu2
    h4 = jnp.dot(h3.astype(jnp.bfloat16), w4_ref[...],
                 preferred_element_type=jnp.float32) + b4
    # sigmoid(x) == 0.5*tanh(0.5*x) + 0.5  -> one EUP op + one VPU FMA.
    out_ref[:, :in_f] = 0.5 * jnp.tanh(0.5 * h4) + 0.5


def dense_vae_forward(x, params, eps):
    """x: (N, C, H, W) float32.  Returns (x_prime, mean, log_var), matching
    the PyTorch DenseVAE.forward (which returns decode's tuple)."""
    N, C, H, W = x.shape
    in_features = H * W
    x_flat = x.reshape(-1, in_features)              # (B, in_features), B = N*C
    B = x_flat.shape[0]

    w1, w4, pack = params
    out_features = w1.shape[1]
    features = eps.shape[1]
    out_width = in_features + MLV_PAD                # x_prime || mean||log_var

    # Row-blocked grid: weights resident, activations blocked on rows.
    row_block = B if B <= 256 else 256
    pad = (-B) % row_block
    if pad:
        x_flat = jnp.pad(x_flat, ((0, pad), (0, 0)))
        eps = jnp.pad(eps, ((0, pad), (0, 0)))
    Bp = B + pad
    grid = (Bp // row_block,)

    flops = 2 * Bp * (in_features * out_features
                      + out_features * 2 * features
                      + features * out_features
                      + out_features * in_features)
    transcendentals = Bp * (features + in_features)       # exp(std) + tanh
    bytes_accessed = ((x_flat.size + eps.size + pack.size + Bp * out_width) * 4
                      + (w1.size + w4.size) * 2)

    out = pl.pallas_call(
        dense_vae_kernel,
        out_shape=jax.ShapeDtypeStruct((Bp, out_width), jnp.float32),
        grid_spec=pltpu.PrefetchScalarGridSpec(
            num_scalar_prefetch=0,
            grid=grid,
            in_specs=[
                pl.BlockSpec((row_block, in_features), lambda i: (i, 0)),  # x
                pl.BlockSpec((row_block, features), lambda i: (i, 0)),     # eps
                pl.BlockSpec(w1.shape, lambda i: (0, 0)),                  # w1 bf16
                pl.BlockSpec(w4.shape, lambda i: (0, 0)),                  # w4 bf16
                pl.BlockSpec(pack.shape, lambda i: (0, 0)),                # f32 pack
            ],
            out_specs=pl.BlockSpec((row_block, out_width), lambda i: (i, 0)),
        ),
        compiler_params=pltpu.CompilerParams(
            dimension_semantics=("parallel",)),
        cost_estimate=pl.CostEstimate(flops=flops,
                                      transcendentals=transcendentals,
                                      bytes_accessed=bytes_accessed),
    )(x_flat, eps, w1, w4, pack)

    x_prime = out[:B, :in_features]
    mean = out[:B, in_features:in_features + features]
    log_var = out[:B, in_features + features:in_features + 2 * features]
    return x_prime, mean, log_var


def init_linear(kw, kb, fan_in, fan_out):
    # PyTorch nn.Linear default: U(-1/sqrt(fan_in), 1/sqrt(fan_in)).
    # Weight stored transposed (in, out); bias kept 2D (1, out).
    bound = 1.0 / math.sqrt(fan_in)
    w = jax.random.uniform(kw, (fan_in, fan_out), jnp.float32, -bound, bound)
    b = jax.random.uniform(kb, (1, fan_out), jnp.float32, -bound, bound)
    return w, b


if __name__ == "__main__":
    key = jax.random.PRNGKey(0)
    keys = jax.random.split(key, 10)

    # Small shapes consistent with the module: in_features = H*W = 256.
    N, C, H, W = 2, 4, 16, 16
    in_features = H * W          # 256
    out_features = 64
    features = 16

    w1_f, b1 = init_linear(keys[0], keys[1], in_features, out_features)    # fc1
    w2_f, b2 = init_linear(keys[2], keys[3], out_features, 2 * features)   # fc2
    w3_f, b3 = init_linear(keys[4], keys[5], features, out_features)       # fc3
    w4_f, b4 = init_linear(keys[6], keys[7], out_features, in_features)    # fc4

    # One f32 pack for the small operands: 4 bias rows (+4 pad rows), then
    # w2 padded to 128 output columns (lane-dense mean||log_var), then w3.
    pack_rows = BIAS_ROWS + out_features + features
    pack = jnp.zeros((pack_rows, in_features), jnp.float32)
    pack = pack.at[0, :out_features].set(b1[0])
    pack = pack.at[1, :2 * features].set(b2[0])
    pack = pack.at[2, :out_features].set(b3[0])
    pack = pack.at[3, :in_features].set(b4[0])
    pack = pack.at[BIAS_ROWS:BIAS_ROWS + out_features, :2 * features].set(w2_f)
    pack = pack.at[BIAS_ROWS + out_features:, :out_features].set(w3_f)

    # Large weights stored bf16 (MXU-native, halves their DMAs).
    w1 = w1_f.astype(jnp.bfloat16)
    w4 = w4_f.astype(jnp.bfloat16)
    params = (w1, w4, pack)

    x = jax.random.normal(keys[8], (N, C, H, W), jnp.float32)
    B = N * C
    # TODO(synk): torch.randn_like noise is generated host-side (no in-kernel RNG).
    eps = jax.random.normal(keys[9], (B, features), jnp.float32)

    out = dense_vae_forward(x, params, eps)
    jax.block_until_ready(out)
    x_prime, mean, log_var = out

    # Pure-JAX f32 reference (generous tolerance: bf16 MXU operands).
    x_flat = x.reshape(-1, in_features)
    enc1_r = jnp.maximum(x_flat @ w1_f + b1, 0.0)
    mlv_r = enc1_r @ w2_f + b2
    mean_r, lv_r = mlv_r[:, :features], mlv_r[:, features:]
    z_r = mean_r + eps * jnp.exp(0.5 * lv_r)
    h_r = jnp.maximum(z_r @ w3_f + b3 + enc1_r, 0.0)
    xp_r = jax.nn.sigmoid(h_r @ w4_f + b4)

    assert x_prime.shape == (B, in_features)
    assert mean.shape == (B, features) and log_var.shape == (B, features)
    assert float(jnp.max(jnp.abs(x_prime - xp_r))) < 5e-2
    assert float(jnp.max(jnp.abs(mean - mean_r))) < 5e-2
    assert float(jnp.max(jnp.abs(log_var - lv_r))) < 5e-2
    print("KERNEL_OK")
</pallas_src>

<mosaic_0001>
module attributes {stable_mosaic.version = 11 : i64} {
  func.func @dense_vae_kernel(%arg0: i32, %arg1: memref<8x256xf32, #tpu.memory_space<vmem>>, %arg2: memref<8x16xf32, #tpu.memory_space<vmem>>, %arg3: memref<256x64xbf16, #tpu.memory_space<vmem>>, %arg4: memref<64x256xbf16, #tpu.memory_space<vmem>>, %arg5: memref<88x256xf32, #tpu.memory_space<vmem>>, %arg6: memref<8x384xf32, #tpu.memory_space<vmem>>) attributes {dimension_semantics = [#tpu.dimension_semantics<parallel>], iteration_bounds = array<i64: 1>, scalar_prefetch = 0 : i64, scratch_operands = 0 : i64, tpu.core_type = #tpu.core_type<tc>, window_params = [{transform_indices = @transform_0, window_bounds = array<i64: 8, 256>}, {transform_indices = @transform_1, window_bounds = array<i64: 8, 16>}, {pipeline_mode = #tpu.pipeline_mode<synchronous>, transform_indices = @transform_2, window_bounds = array<i64: 256, 64>}, {pipeline_mode = #tpu.pipeline_mode<synchronous>, transform_indices = @transform_3, window_bounds = array<i64: 64, 256>}, {pipeline_mode = #tpu.pipeline_mode<synchronous>, transform_indices = @transform_4, window_bounds = array<i64: 88, 256>}, {transform_indices = @transform_5, window_bounds = array<i64: 8, 384>}]} {
    %c0 = arith.constant 0 : index
    %c0_0 = arith.constant 0 : index
    %0 = vector.load %arg5[%c0, %c0_0] : memref<88x256xf32, #tpu.memory_space<vmem>>, vector<1x64xf32>
    %c1 = arith.constant 1 : index
    %c0_1 = arith.constant 0 : index
    %1 = vector.load %arg5[%c1, %c0_1] : memref<88x256xf32, #tpu.memory_space<vmem>>, vector<1x128xf32>
    %c2 = arith.constant 2 : index
    %c0_2 = arith.constant 0 : index
    %2 = vector.load %arg5[%c2, %c0_2] : memref<88x256xf32, #tpu.memory_space<vmem>>, vector<1x64xf32>
    %c3 = arith.constant 3 : index
    %c0_3 = arith.constant 0 : index
    %3 = vector.load %arg5[%c3, %c0_3] : memref<88x256xf32, #tpu.memory_space<vmem>>, vector<1x256xf32>
    %c8 = arith.constant 8 : index
    %c0_4 = arith.constant 0 : index
    %4 = vector.load %arg5[%c8, %c0_4] : memref<88x256xf32, #tpu.memory_space<vmem>>, vector<64x128xf32>
    %5 = arith.truncf %4 : vector<64x128xf32> to vector<64x128xbf16>
    %c72 = arith.constant 72 : index
    %c0_5 = arith.constant 0 : index
    %6 = vector.load %arg5[%c72, %c0_5] : memref<88x256xf32, #tpu.memory_space<vmem>>, vector<16x64xf32>
    %7 = arith.truncf %6 : vector<16x64xf32> to vector<16x64xbf16>
    %c0_6 = arith.constant 0 : index
    %c0_7 = arith.constant 0 : index
    %8 = vector.load %arg1[%c0_6, %c0_7] : memref<8x256xf32, #tpu.memory_space<vmem>>, vector<8x256xf32>
    %9 = arith.truncf %8 : vector<8x256xf32> to vector<8x256xbf16>
    %c0_8 = arith.constant 0 : index
    %c0_9 = arith.constant 0 : index
    %10 = vector.load %arg3[%c0_8, %c0_9] : memref<256x64xbf16, #tpu.memory_space<vmem>>, vector<256x64xbf16>
    %cst = arith.constant dense<0.000000e+00> : vector<8x64xf32>
    %11 = tpu.matmul %9, %10, %cst {dimension_numbers = #tpu.dot_dimension_numbers<[1], [0], [0], [1], [0, 0, 1, 1], [], []>} : vector<8x256xbf16>, vector<256x64xbf16>, vector<8x64xf32> -> vector<8x64xf32>
    %12 = vector.broadcast %0 : vector<1x64xf32> to vector<8x64xf32>
    %13 = arith.addf %11, %12 : vector<8x64xf32>
    %cst_10 = arith.constant 0.000000e+00 : f32
    %14 = vector.broadcast %cst_10 : f32 to vector<8x64xf32>
    %15 = arith.maximumf %13, %14 : vector<8x64xf32>
    %16 = arith.truncf %15 : vector<8x64xf32> to vector<8x64xbf16>
    %cst_11 = arith.constant dense<0.000000e+00> : vector<8x128xf32>
    %17 = tpu.matmul %16, %5, %cst_11 {dimension_numbers = #tpu.dot_dimension_numbers<[1], [0], [0], [1], [0, 0, 1, 1], [], []>} : vector<8x64xbf16>, vector<64x128xbf16>, vector<8x128xf32> -> vector<8x128xf32>
    %18 = vector.broadcast %1 : vector<1x128xf32> to vector<8x128xf32>
    %19 = arith.addf %17, %18 : vector<8x128xf32>
    %20 = vector.extract_strided_slice %19 {offsets = [0, 0], sizes = [8, 16], strides = [1, 1]} : vector<8x128xf32> to vector<8x16xf32>
    %21 = vector.extract_strided_slice %19 {offsets = [0, 16], sizes = [8, 16], strides = [1, 1]} : vector<8x128xf32> to vector<8x16xf32>
    %c0_12 = arith.constant 0 : index
    %c256 = arith.constant 256 : index
    %22 = vector.load %arg6[%c0_12, %c256] : memref<8x384xf32, #tpu.memory_space<vmem>>, vector<8x128xf32>
    tpu.vector_store %arg6[%c0_12, %c256], %19 {strides = array<i32>} : memref<8x384xf32, #tpu.memory_space<vmem>>, vector<8x128xf32>,
    %cst_13 = arith.constant 5.000000e-01 : f32
    %23 = vector.broadcast %cst_13 : f32 to vector<8x16xf32>
    %24 = arith.mulf %23, %21 : vector<8x16xf32>
    %25 = math.exp %24 : vector<8x16xf32>
    %c0_14 = arith.constant 0 : index
    %c0_15 = arith.constant 0 : index
    %26 = vector.load %arg2[%c0_14, %c0_15] : memref<8x16xf32, #tpu.memory_space<vmem>>, vector<8x16xf32>
    %27 = arith.mulf %26, %25 : vector<8x16xf32>
    %28 = arith.addf %20, %27 : vector<8x16xf32>
    %29 = arith.truncf %28 : vector<8x16xf32> to vector<8x16xbf16>
    %cst_16 = arith.constant dense<0.000000e+00> : vector<8x64xf32>
    %30 = tpu.matmul %29, %7, %cst_16 {dimension_numbers = #tpu.dot_dimension_numbers<[1], [0], [0], [1], [0, 0, 1, 1], [], []>} : vector<8x16xbf16>, vector<16x64xbf16>, vector<8x64xf32> -> vector<8x64xf32>
    %31 = vector.broadcast %2 : vector<1x64xf32> to vector<8x64xf32>
    %32 = arith.addf %30, %31 : vector<8x64xf32>
    %33 = arith.addf %32, %15 : vector<8x64xf32>
    %cst_17 = arith.constant 0.000000e+00 : f32
    %34 = vector.broadcast %cst_17 : f32 to vector<8x64xf32>
    %35 = arith.maximumf %33, %34 : vector<8x64xf32>
    %36 = arith.truncf %35 : vector<8x64xf32> to vector<8x64xbf16>
    %c0_18 = arith.constant 0 : index
    %c0_19 = arith.constant 0 : index
    %37 = vector.load %arg4[%c0_18, %c0_19] : memref<64x256xbf16, #tpu.memory_space<vmem>>, vector<64x256xbf16>
    %cst_20 = arith.constant dense<0.000000e+00> : vector<8x256xf32>
    %38 = tpu.matmul %36, %37, %cst_20 {dimension_numbers = #tpu.dot_dimension_numbers<[1], [0], [0], [1], [0, 0, 1, 1], [], []>} : vector<8x64xbf16>, vector<64x256xbf16>, vector<8x256xf32> -> vector<8x256xf32>
    %39 = vector.broadcast %3 : vector<1x256xf32> to vector<8x256xf32>
    %40 = arith.addf %38, %39 : vector<8x256xf32>
    %cst_21 = arith.constant 5.000000e-01 : f32
    %41 = vector.broadcast %cst_21 : f32 to vector<8x256xf32>
    %42 = arith.mulf %41, %40 : vector<8x256xf32>
    %43 = math.tanh %42 : vector<8x256xf32>
    %cst_22 = arith.constant 5.000000e-01 : f32
    %44 = vector.broadcast %cst_22 : f32 to vector<8x256xf32>
    %45 = arith.mulf %44, %43 : vector<8x256xf32>
    %cst_23 = arith.constant 5.000000e-01 : f32
    %46 = vector.broadcast %cst_23 : f32 to vector<8x256xf32>
    %47 = arith.addf %45, %46 : vector<8x256xf32>
    %c0_24 = arith.constant 0 : index
    %c0_25 = arith.constant 0 : index
    %48 = vector.load %arg6[%c0_24, %c0_25] : memref<8x384xf32, #tpu.memory_space<vmem>>, vector<8x256xf32>
    tpu.vector_store %arg6[%c0_24, %c0_25], %47 {strides = array<i32>} : memref<8x384xf32, #tpu.memory_space<vmem>>, vector<8x256xf32>,
    return
  }
  func.func @transform_0(%arg0: i32) -> (i32, i32) {
    %c0_i32 = arith.constant 0 : i32
    %c0_i32_0 = arith.constant 0 : i32
    return %arg0, %c0_i32 : i32, i32
  }
  func.func @transform_1(%arg0: i32) -> (i32, i32) {
    %c0_i32 = arith.constant 0 : i32
    %c0_i32_0 = arith.constant 0 : i32
    return %arg0, %c0_i32 : i32, i32
  }
  func.func @transform_2(%arg0: i32) -> (i32, i32) {
    %c0_i32 = arith.constant 0 : i32
    %c0_i32_0 = arith.constant 0 : i32
    %c0_i32_1 = arith.constant 0 : i32
    return %c0_i32, %c0_i32_0 : i32, i32
  }
  func.func @transform_3(%arg0: i32) -> (i32, i32) {
    %c0_i32 = arith.constant 0 : i32
    %c0_i32_0 = arith.constant 0 : i32
    %c0_i32_1 = arith.constant 0 : i32
    return %c0_i32, %c0_i32_0 : i32, i32
  }
  func.func @transform_4(%arg0: i32) -> (i32, i32) {
    %c0_i32 = arith.constant 0 : i32
    %c0_i32_0 = arith.constant 0 : i32
    %c0_i32_1 = arith.constant 0 : i32
    return %c0_i32, %c0_i32_0 : i32, i32
  }
  func.func @transform_5(%arg0: i32) -> (i32, i32) {
    %c0_i32 = arith.constant 0 : i32
    %c0_i32_0 = arith.constant 0 : i32
    return %arg0, %c0_i32 : i32, i32
  }
}

</mosaic_0001>

<bundles_post_ra>
// kernel: tpu_custom_call.1
= control target key start
LH: loop header
LB: loop body
LE: loop exit
PB: predicated region body
PF: predicated region fallthrough
CT: control target
= control target key end

     0   :  { %10 = vsyncpa [#allocation3], 0  ;;  %s796_s0 = inlined_call_operand.vmem [shape: f32[8,256], index: 0, kind: input, shape index: {}]   ;;  %s797_s1 = inlined_call_operand.vmem [shape: f32[8,16], index: 1, kind: input, shape index: {}]   ;;  %s798_s2 = inlined_call_operand.vmem [shape: bf16[256,64], index: 2, kind: input, shape index: {}]   ;;  %s799_s3 = inlined_call_operand.hbm [shape: bf16[64,256], index: 3, kind: input, shape index: {}]   ;;  %s800_s4 = inlined_call_operand.vmem [shape: f32[88,256], index: 4, kind: input, shape index: {}]   ;;  %s801_s5 = inlined_call_operand.hbm [shape: f32[8,384], index: 5, kind: output, shape index: {}]  }
   0x1   :  { %11 = vsyncpa [#allocation4], 0  ;;  %s626_s18 = smov [#allocation2]   ;;  %s578_s22 = scalar_lea.hbm %s799_s3, 1024 }
   0x2   :  { %s23_s19 = sshll.u32 %s626_s18, 4  ;;  %p579_p0 = scmp.ne.s32.totalorder %s799_s3, %s578_s22  ;;  %s24_s19 = int_to_ptr.vmem [resolvable:$true] %s23_s19 }
   0x3   :  { %p582_p1 = scmp.lt.u32.totalorder %s578_s22, %s799_s3 }
   0x5   :  { %p584_p2 = pnand %p582_p1, %p579_p0 }
   0x7   :  { %587 = shalt.err (!%p584_p2)
}
   0x8   :  { %s588_s27 = scalar_lea.vmem %s24_s19, 1024  ;;  %p593_p4 = scmp.lt.s32.totalorder %s24_s19, %s24_s19 }
   0x9   :  { %p589_p3 = scmp.ne.s32.totalorder %s24_s19, %s588_s27  ;;  %p594_p5 = scmp.lt.s32.totalorder %s588_s27, %s588_s27 }
   0xb   :  { %p595_p6 = por %p594_p5, %p593_p4 }
   0xd   :  { %p596_p7 = pnand %p595_p6, %p589_p3 }
   0xf   :  { %599 = shalt.err (!%p596_p7)
}
  0x10   :  { %s627_s28 = smov 128   ;;  %s628_s29 = smov 8  }
  0x11   :  { %29 = dma.hbm_to_vmem [thread:$0]  %s799_s3, 1024, %s24_s19, [#allocation3], %s627_s28, %s627_s28, %s628_s29  }
  0x12   :  { %622 = dma.done.wait [#allocation3], 1024  }
  0x13   :  { %623 = vsyncadd [#allocation3], 4294966272  ;;  %v629_v0 = vmov 0.0   ;;  %v544_v1 = vld [vmem:[%s798_s2 + $0x40] sm:$0xff]   ;;  %v546_v3 = vld [vmem:[%s798_s2 + $0x48] sm:$0xff]   ;;  %vm630_vm0 = vmmov 0  }
  0x14   :  { %518 = vmatprep.subr.bf16.mxu1 %v629_v0  ;;  %v545_v2 = vld [vmem:[%s798_s2] sm:$0xff]   ;;  %489 = vmatprep.subr.bf16.mxu0 %v544_v1  ;;  %v547_v4 = vld [vmem:[%s798_s2 + $0x8] sm:$0xff]   ;;  %v548_v5 = vld [vmem:[%s798_s2 + $0x50] sm:$0xff]   ;;  %vm230_vm1 = vcmask 523264   ;;  %s631_s3 = smov 112   ;;  %vm286_vm2 = vcmask 130048  }
  0x15   :  { %490 = vmatpush3.bf16.msra.mxu0 %v545_v2  ;;  %v549_v6 = vld [vmem:[%s798_s2 + $0x10] sm:$0xff]   ;;  %v550_v7 = vld [vmem:[%s798_s2 + $0x58] sm:$0xff]   ;;  %v552_v9 = vld [vmem:[%s798_s2 + $0x60] sm:$0xff]   ;;  %526 = vmatprep.mubr.msk.bf16.mxu1 %vm630_vm0, %v629_v0  ;;  %s633_s18 = smov [#allocation5]  }
  0x16   :  { %491 = vmatprep.subr.bf16.mxu0 %v546_v3  ;;  %v551_v8 = vld [vmem:[%s798_s2 + $0x18] sm:$0xff]   ;;  %v553_v10 = vld [vmem:[%s798_s2 + $0x20] sm:$0xff]   ;;  %v554_v11 = vld [vmem:[%s798_s2 + $0x68] sm:$0xff]   ;;  %v632_v3 = vmov 0   ;;  %s452_s19 = sshll.u32 %s633_s18, 4  ;;  %s453_s19 = int_to_ptr.vmem [resolvable:$true] %s452_s19 }
  0x17   :  { %v57_v12 = vld [vmem:[%s796_s0 + $0x8] sm:$0xff]  ;;  %v41_v13 = vld [vmem:[%s800_s4 + $0x10] sm:$0xff]  ;;  %v42_v16 = vld [vmem:[%s800_s4 + $0x20] sm:$0xff]  ;;  %p605_p9 = scmp.lt.s32.totalorder %s453_s19, %s453_s19 }
  0x18   :  { %v555_v14 = vld [vmem:[%s798_s2 + $0x28] sm:$0xff]   ;;  %v59_v15 = vpack.c.bf16 %v57_v12, %v57_v12  ;;  %v43_v17 = vld [vmem:[%s800_s4 + $0x30] sm:$0xff]  ;;  %v44_v18 = vld [vmem:[%s800_s4 + $0x40] sm:$0xff]  ;;  %v49_v19 = vpack.c.bf16 %v42_v16, %v41_v13  ;;  %v342_v13 = vlaneseq }
  0x19   :  { %492 = vmatpush3.bf16.msra.mxu0 %v547_v4  ;;  %v556_v20 = vld [vmem:[%s798_s2 + $0x70] sm:$0xff]   ;;  %v50_v21 = vpack.c.bf16 %v44_v18, %v43_v17  ;;  %v558_v23 = vld [vmem:[%s798_s2 + $0x78] sm:$0xff]   ;;  %v56_v25 = vld [vmem:[%s796_s0] sm:$0xff] }
  0x1a   :  { %493 = vmatprep.subr.bf16.mxu0 %v548_v5  ;;  %220 = vmatprep.mubr.bf16.mxu0 %v59_v15  ;;  %v557_v22 = vld [vmem:[%s798_s2 + $0x30] sm:$0xff]   ;;  %v559_v24 = vld [vmem:[%s798_s2 + $0x38] sm:$0xff]   ;;  %v58_v26 = vpack.c.bf16 %v56_v25, %v56_v25  ;;  %v46_v28 = vld [vmem:[%s800_s4 + $0x60] sm:$0xff] }
  0x1b   :  { %519 = vmatpush3.bf16.msra.mxu1 %v49_v19  ;;  %v45_v27 = vld [vmem:[%s800_s4 + $0x50] sm:$0xff]  ;;  %v48_v31 = vld [vmem:[%s800_s4 + $0x80] sm:$0xff] }
  0x1c   :  { %520 = vmatprep.subr.bf16.mxu1 %v629_v0  ;;  %v51_v29 = vpack.c.bf16 %v46_v28, %v45_v27  ;;  %v47_v30 = vld [vmem:[%s800_s4 + $0x70] sm:$0xff]  ;;  %v36_v34 = vld [vmem:[%s800_s4] ss:$0 sm:$0xff]  ;;  %v37_v45 = vld [vmem:[%s800_s4 + $0x1] ss:$0 sm:$0xff] }
  0x1d   :  { %494 = vmatpush3.bf16.msra.mxu0 %v549_v6  ;;  %v52_v32 = vpack.c.bf16 %v48_v31, %v47_v30  ;;  %v53_v42 = vld [vmem:[%s800_s4 + $0x90] sm:$0xff]  ;;  %v54_v43 = vld [vmem:[%s800_s4 + $0xa0] sm:$0xff] }
  0x1e   :  { %495 = vmatprep.subr.bf16.mxu0 %v550_v7  ;;  %v55_v44 = vpack.c.bf16 %v54_v43, %v53_v42  ;;  %v562_v53 = vld [vmem:[#allocation2 + $0x4] ss:$8 sps:$4 sm:$0xff]   ;;  %v560_v59 = vld [vmem:[#allocation2] ss:$8 sps:$4 sm:$0xff]   ;;  %v565_v61 = vld [vmem:[#allocation2 + $0x14] ss:$8 sps:$4 sm:$0xff]  }
  0x1f   :  { %521 = vmatpush3.bf16.msra.mxu1 %v50_v21  ;;  %v278_v55 = vld [vmem:[%s797_s1] sm:$0xff]  ;;  %v563_v62 = vld [vmem:[#allocation2 + $0x10] ss:$8 sps:$4 sm:$0xff]   ;;  %v571_v1 = vld [vmem:[#allocation2 + $0x34] ss:$8 sps:$4 sm:$0xff]  }
  0x20   :  { %522 = vmatprep.subr.bf16.mxu1 %v629_v0  ;;  %v568_v63 = vld [vmem:[#allocation2 + $0x24] ss:$8 sps:$4 sm:$0xff]   ;;  %v569_v2 = vld [vmem:[#allocation2 + $0x30] ss:$8 sps:$4 sm:$0xff]   ;;  %v38_v4 = vld [vmem:[%s800_s4 + $0x2] ss:$0 sm:$0xff] }
  0x21   :  { %496 = vmatpush3.bf16.msra.mxu0 %v551_v8  ;;  %v461_v16 = vld [vmem:[%s800_s4 + $0x3] ss:$8 sm:$0x3]  ;;  %s600_s4 = scalar_lea.vmem %s453_s19, 384 }
  0x22   :  { %497 = vmatprep.subr.bf16.mxu0 %v552_v9  ;;  %p601_p8 = scmp.ne.s32.totalorder %s453_s19, %s600_s4  ;;  %p606_p10 = scmp.lt.s32.totalorder %s600_s4, %s600_s4 }
  0x23   :  { %523 = vmatpush3.bf16.msra.mxu1 %v51_v29 }
  0x24   :  { %524 = vmatprep.subr.bf16.mxu1 %v629_v0  ;;  %p607_p11 = por %p606_p10, %p605_p9 }
  0x25   :  { %498 = vmatpush3.bf16.msra.mxu0 %v553_v10 }
  0x26   :  { %499 = vmatprep.subr.bf16.mxu0 %v554_v11  ;;  %p608_p12 = pnand %p607_p11, %p601_p8 }
  0x27   :  { %525 = vmatpush3.bf16.msra.mxu1 %v52_v32 }
  0x28   :  { %530 = vmatprep.subr.bf16.mxu1 %v629_v0 }
  0x29   :  { %500 = vmatpush3.bf16.msra.mxu0 %v555_v14  ;;  %v343_v14 = vshrl.u32 %v342_v13, 7 }
  0x2a   :  { %501 = vmatprep.subr.bf16.mxu0 %v556_v20 }
  0x2b   :  { %v344_v15 = vsub.s32 0, %v343_v14  ;;  %v348_v17 = vsub.s32 1, %v343_v14 }
  0x2d   :  { %502 = vmatpush3.bf16.msra.mxu0 %v557_v22  ;;  %v345_v18 = vrot.slane %v461_v16, %v344_v15  ;;  %v349_v19 = vrot.slane %v461_v16, %v348_v17 }
  0x2e   :  { %503 = vmatprep.subr.bf16.mxu0 %v558_v23 }
  0x31   :  { %504 = vmatpush3.bf16.msra.mxu0 %v559_v24 }
  0x34   :  { %221 = vmatmul.mubr.bf16.vlgmr.msra.gmra.mrb[0].mxu0 %v58_v26 }
 0x107   :  { %v505_v33 = vpop.f32.mrb[0].mxu0 }
 0x108   :  { %v506_v35 = vpop.f32.mrb[1].mxu0 }
 0x109   :  { %v507_v36 = vadd.f32 %v506_v35, %v505_v33  ;;  %v508_v37 = vpop.f32.mrb[2].mxu0 }
 0x10a   :  { %v509_v38 = vpop.f32.mrb[3].mxu0 }
 0x10b   :  { %v223_v39 = vadd.f32 %v507_v36, %v36_v34 }
 0x10d   :  { %v228_v40 = vmax.f32 %v223_v39, 0.0 }
 0x10f   :  { %v229_v41 = vpack.c.bf16 %v228_v40, %v228_v40 }
 0x111   :  { %527 = vmatmul.mubr.msk.bf16.vlgmr.msra.gmra.mrb[0].mxu1 %vm230_vm1, %v229_v41 }
 0x112   :  { %532 = vmatprep.mubr.msk.bf16.mxu1 %vm630_vm0, %v629_v0  ;;  %531 = vmatpush3.bf16.msra.mxu1 %v55_v44  ;;  %v566_v0 = vld [vmem:[#allocation2 + $0x20] ss:$8 sps:$4 sm:$0xff]  }
 0x113   :  { %395 = vmatprep.subr.bf16.mxu1 %v562_v53 }
 0x1e4   :  { %v268_v46 = vpop.f32.mrb[0].mxu1 }
 0x1e5   :  { %v269_v47 = vadd.f32 %v268_v46, %v37_v45  ;;  %v528_v48 = vpop.f32.mrb[1].mxu1 }
 0x1e6   :  { %v271_v49 = vpop.f32.mrb[2].mxu1 }
 0x1e7   :  { %274 = vst [vmem:[#allocation5 + $0x10] sm:$0xff] %v269_v47  ;;  %v275_v50 = vmul.f32 0.5, %v269_v47  ;;  %v529_v51 = vpop.f32.mrb[3].mxu1 }
 0x1e9   :  { %v276_v52 = vmul.f32 1.442695, %v275_v50 }
 0x1eb   :  { %572 = vpow2.f32 %v276_v52 }
 0x1f5   :  { %v573_v54 = vpop.eup %572 }
 0x1f6   :  { %280 = vrot.lane.b32.xlu0 %v573_v54, %s631_s3 }
 0x268   :  { %v281_v56 = vpop.permute.xlu0 %280 }
 0x269   :  { %v283_v57 = vmul.f32 %v281_v56, %v278_v55 }
 0x26b   :  { %v284_v58 = vadd.f32 %v283_v57, %v269_v47 }
 0x26d   :  { %v285_v60 = vpack.c.bf16 %v284_v58, %v284_v58 }
 0x26f   :  { %533 = vmatmul.mubr.msk.bf16.vlgmr.msra.gmra.mrb[4].mxu1 %vm286_vm2, %v285_v60 }
 0x270   :  { %396 = vmatpush1.bf16.msra.mxu1 %v560_v59  ;;  %427 = vmatprep.mubr.bf16.mxu1 %v632_v3 }
 0x271   :  { %397 = vmatprep.subr.bf16.mxu1 %v565_v61 }
 0x274   :  { %398 = vmatpush1.bf16.msra.mxu1 %v563_v62 }
 0x275   :  { %399 = vmatprep.subr.bf16.mxu1 %v568_v63 }
 0x278   :  { %400 = vmatpush1.bf16.msra.mxu1 %v566_v0 }
 0x279   :  { %401 = vmatprep.subr.bf16.mxu1 %v571_v1 }
 0x27c   :  { %402 = vmatpush1.bf16.msra.mxu1 %v569_v2 }
 0x342   :  { %v324_v5 = vpop.f32.mrb[4].mxu1 }
 0x343   :  { %v325_v6 = vadd.f32 %v324_v5, %v38_v4  ;;  %v534_v7 = vpop.f32.mrb[5].mxu1 }
 0x344   :  { %v327_v8 = vpop.f32.mrb[6].mxu1 }
 0x345   :  { %v330_v9 = vadd.f32 %v325_v6, %v228_v40  ;;  %v535_v10 = vpop.f32.mrb[7].mxu1 }
 0x347   :  { %v331_v11 = vmax.f32 %v330_v9, 0.0 }
 0x349   :  { %v332_v12 = vpack.c.bf16 %v331_v11, %v331_v11 }
 0x34b   :  { %488 = vmatmul.mubr.msk.bf16.vlgmr.msra.gmra.mrb[8].mxu1 %vm230_vm1, %v332_v12 }
 0x41e   :  { %v429_v20 = vpop.f32.mrb[8].mxu1 }
 0x41f   :  { %v430_v21 = vadd.f32 %v429_v20, %v345_v18  ;;  %v431_v22 = vpop.f32.mrb[9].mxu1 }
 0x420   :  { %v432_v23 = vadd.f32 %v431_v22, %v349_v19  ;;  %v433_v24 = vpop.f32.mrb[10].mxu1 }
 0x421   :  { %v436_v25 = vmul.f32 0.5, %v430_v21  ;;  %v434_v26 = vpop.f32.mrb[11].mxu1 }
 0x422   :  { %v437_v27 = vmul.f32 0.5, %v432_v23 }
 0x423   :  { %574 = vtanh.f32 %v436_v25 }
 0x424   :  { %576 = vtanh.f32 %v437_v27 }
 0x42d   :  { %v575_v28 = vpop.eup %574 }
 0x42e   :  { %v577_v29 = vpop.eup %576  ;;  %v440_v30 = vmul.f32 0.5, %v575_v28 }
 0x42f   :  { %v441_v31 = vmul.f32 0.5, %v577_v29 }
 0x430   :  { %v442_v32 = vadd.f32 0.5, %v440_v30 }
 0x431   :  { %v443_v33 = vadd.f32 0.5, %v441_v31 }
 0x432   :  { %444 = vst [vmem:[#allocation5] sm:$0xff] %v442_v32 }
 0x433   :  { %445 = vst [vmem:[#allocation5 + $0x8] sm:$0xff] %v443_v33 }
 0x434   :  { %611 = shalt.err (!%p608_p12)
}
 0x435   :  { %s612_s22 = scalar_lea.hbm %s801_s5, 384 }
 0x436   :  { %p613_p13 = scmp.ne.s32.totalorder %s801_s5, %s612_s22  ;;  %p616_p0 = scmp.lt.u32.totalorder %s612_s22, %s801_s5 }
 0x438   :  { %p618_p1 = pnand %p616_p0, %p613_p13 }
 0x43a   :  { %621 = shalt.err (!%p618_p1)
}
 0x43b   :  { %455 = dma.vmem_to_hbm [thread:$0]  %s453_s19, 384, %s801_s5, [#allocation4]  }
 0x43c   :  { %624 = dma.done.wait [#allocation4], 384  }
 0x43d   :  { %625 = vsyncadd [#allocation4], 4294966912 }
 0x43e   :  { %459 = vsyncpa [#allocation3], 1 }
 0x43f   :  { %460 = vsyncpa [#allocation4], 1 }

</bundles_post_ra>
